<compile_context>
chip_gen: v5e
topology: v5e:2x2
jax: 0.10.0
libtpu: 0.0.40
codegen_flags: <defaults>
</compile_context>

<pallas_src>
import jax
import jax.numpy as jnp
from jax.experimental import pallas as pl
from jax.experimental.pallas import tpu as pltpu


# ---------------------------------------------------------------------------
# Small-N path: single (1, N) block, no grid.
# ---------------------------------------------------------------------------
def _gradnorm_small_kernel(l_ref, w_ref, out_ref):
    # Keep HBM dtype (possibly bf16); upcast in-register and accumulate in f32.
    prod = l_ref[...].astype(jnp.float32) * w_ref[...].astype(jnp.float32)
    out_ref[0, 0] = jnp.sum(prod)


# ---------------------------------------------------------------------------
# Large-N path: lane-dense (block_rows, 128) tiles, SMEM scalar accumulator.
# ---------------------------------------------------------------------------
def _gradnorm_tiled_kernel(l_ref, w_ref, out_ref, acc_ref):
    i = pl.program_id(0)

    @pl.when(i == 0)
    def _():
        acc_ref[0] = 0.0

    prod = l_ref[...].astype(jnp.float32) * w_ref[...].astype(jnp.float32)
    acc_ref[0] += jnp.sum(prod)  # VPU multiply + reduce; MXU untouched.

    @pl.when(i == pl.num_programs(0) - 1)
    def _():
        out_ref[0, 0] = acc_ref[0]


def gradnorm_forward(L_t: jax.Array, w: jax.Array,
                     *, small_n_threshold: int = 4096,
                     tile_rows_max: int = 2048) -> jax.Array:
    """total_loss = sum(L_t * w), accumulated in f32. Returns a 0-d f32 array."""
    n = L_t.shape[0]

    if n <= small_n_threshold:
        out = pl.pallas_call(
            _gradnorm_small_kernel,
            out_shape=jax.ShapeDtypeStruct((1, 1), jnp.float32),
            in_specs=[
                pl.BlockSpec(memory_space=pltpu.VMEM),
                pl.BlockSpec(memory_space=pltpu.VMEM),
            ],
            out_specs=pl.BlockSpec(memory_space=pltpu.SMEM),
        )(L_t.reshape(1, n), w.reshape(1, n))
        return jnp.squeeze(out)

    # ---- tiled reduction for large N ----
    lanes = 128
    rows = pl.cdiv(n, lanes)
    block_rows = min(rows, tile_rows_max)
    if block_rows < rows:
        block_rows = max(8, (block_rows // 8) * 8)  # sublane-aligned blocks
    rows_padded = pl.cdiv(rows, block_rows) * block_rows
    n_padded = rows_padded * lanes

    # Present inputs as lane-dense (rows, 128) slabs in the original HBM dtype.
    # Zero-pad the tail only when needed (zeros contribute nothing to the sum);
    # when n is already a multiple of the block size this is a free reshape.
    if n_padded != n:
        l2 = jnp.pad(L_t, (0, n_padded - n)).reshape(rows_padded, lanes)
        w2 = jnp.pad(w, (0, n_padded - n)).reshape(rows_padded, lanes)
    else:
        l2 = L_t.reshape(rows_padded, lanes)
        w2 = w.reshape(rows_padded, lanes)

    grid = (rows_padded // block_rows,)
    out = pl.pallas_call(
        _gradnorm_tiled_kernel,
        out_shape=jax.ShapeDtypeStruct((1, 1), jnp.float32),
        grid_spec=pltpu.PrefetchScalarGridSpec(
            num_scalar_prefetch=0,
            grid=grid,
            in_specs=[
                pl.BlockSpec((block_rows, lanes), lambda i: (i, 0)),
                pl.BlockSpec((block_rows, lanes), lambda i: (i, 0)),
            ],
            out_specs=pl.BlockSpec((1, 1), lambda i: (0, 0),
                                   memory_space=pltpu.SMEM),
            scratch_shapes=[pltpu.SMEM((1,), jnp.float32)],
        ),
        compiler_params=pltpu.CompilerParams(
            dimension_semantics=("arbitrary",),      # reduction axis
            vmem_limit_bytes=32 * 1024 * 1024,       # under v7x's 64 MiB
        ),
    )(l2, w2)
    return jnp.squeeze(out)


class GradNorm:
    """JAX/Pallas port of the PyTorch GradNorm module's forward pass."""

    def __init__(self, num_of_task: int, alpha: float = 1.5):
        self.num_of_task = num_of_task
        self.alpha = alpha
        # nn.Parameter(torch.ones(num_of_task)) -> deterministic init
        self.w = jnp.ones((num_of_task,), dtype=jnp.float32)
        self.L_0 = None
        # TODO(synk): additional_forward_and_backward needs torch.autograd-style
        # per-task grads through an external module + optimizer.step(); it has
        # no single-kernel Pallas forward equivalent and is not implemented.

    def forward(self, L_t: jax.Array) -> jax.Array:
        if self.L_0 is None:
            self.L_0 = jax.lax.stop_gradient(L_t)
        self.L_t = L_t
        self.total_loss = gradnorm_forward(L_t, self.w)
        return self.total_loss

    __call__ = forward


if __name__ == "__main__":
    key = jax.random.PRNGKey(0)

    # --- Small path: matches the module's intended use (vector of task losses).
    num_of_task = 8
    L_t = jnp.abs(jax.random.normal(key, (num_of_task,), dtype=jnp.float32))

    module = GradNorm(num_of_task)
    total_loss = jax.block_until_ready(module(L_t))
    ref = jnp.sum(L_t * module.w)
    assert jnp.allclose(total_loss, ref, rtol=1e-6, atol=1e-6), (total_loss, ref)

    # --- Tiled large-N path, ragged length: bf16 inputs in HBM, non-multiple
    #     length (exercises the zero-padding branch), multi-step grid reduction.
    n_large = 5000
    k1, k2 = jax.random.split(key)
    L_big = jnp.abs(jax.random.normal(k1, (n_large,), dtype=jnp.float32)
                    ).astype(jnp.bfloat16)
    w_big = jnp.ones((n_large,), dtype=jnp.float32)
    out_big = jax.block_until_ready(
        gradnorm_forward(L_big, w_big, small_n_threshold=1024, tile_rows_max=8))
    ref_big = jnp.sum(L_big.astype(jnp.float32) * w_big)
    assert jnp.allclose(out_big, ref_big, rtol=1e-3, atol=1e-2), (out_big, ref_big)

    # --- Tiled large-N path, exact multiple: exercises the no-padding branch
    #     (free reshape, no extra HBM pass).
    n_exact = 4096
    L_ex = jnp.abs(jax.random.normal(k2, (n_exact,), dtype=jnp.float32))
    w_ex = jnp.full((n_exact,), 0.5, dtype=jnp.float32)
    out_ex = jax.block_until_ready(
        gradnorm_forward(L_ex, w_ex, small_n_threshold=1024, tile_rows_max=8))
    ref_ex = jnp.sum(L_ex * w_ex)
    assert jnp.allclose(out_ex, ref_ex, rtol=1e-5, atol=1e-4), (out_ex, ref_ex)

    print("KERNEL_OK")
</pallas_src>

<mosaic_0001>
module attributes {stable_mosaic.version = 11 : i64} {
  func.func @_gradnorm_small_kernel(%arg0: memref<1x8xf32, #tpu.memory_space<vmem>>, %arg1: memref<1x8xf32, #tpu.memory_space<vmem>>, %arg2: memref<1x1xf32, #tpu.memory_space<smem>>) attributes {dimension_semantics = [], scalar_prefetch = 0 : i64, scratch_operands = 0 : i64, tpu.core_type = #tpu.core_type<tc>} {
    %c0 = arith.constant 0 : index
    %c0_0 = arith.constant 0 : index
    %0 = vector.load %arg0[%c0, %c0_0] : memref<1x8xf32, #tpu.memory_space<vmem>>, vector<1x8xf32>
    %c0_1 = arith.constant 0 : index
    %c0_2 = arith.constant 0 : index
    %1 = vector.load %arg1[%c0_1, %c0_2] : memref<1x8xf32, #tpu.memory_space<vmem>>, vector<1x8xf32>
    %2 = arith.mulf %0, %1 : vector<1x8xf32>
    %3 = vector.shape_cast %2 : vector<1x8xf32> to vector<1x1x8xf32>
    %cst = arith.constant dense<0.000000e+00> : vector<1xf32>
    %4 = vector.multi_reduction <add>, %3, %cst [1, 2] : vector<1x1x8xf32> to vector<1xf32>
    %5 = vector.shape_cast %4 : vector<1xf32> to vector<1x1x1xf32>
    %6 = vector.extract %5[0, 0, 0] : f32 from vector<1x1x1xf32>
    %c0_3 = arith.constant 0 : index
    %c0_4 = arith.constant 0 : index
    %7 = memref.load %arg2[%c0_3, %c0_4] : memref<1x1xf32, #tpu.memory_space<smem>>
    memref.store %6, %arg2[%c0_3, %c0_4] : memref<1x1xf32, #tpu.memory_space<smem>>
    return
  }
}

</mosaic_0001>

<bundles_post_ra>
// kernel: tpu_custom_call.1
= control target key start
LH: loop header
LB: loop body
LE: loop exit
PB: predicated region body
PF: predicated region fallthrough
CT: control target
= control target key end

     0   :  { %7 = vsyncpa [#allocation3], 0  ;;  %s171_s0 = inlined_call_operand.hbm [shape: f32[1,8], index: 0, kind: input, shape index: {}]   ;;  %s172_s1 = inlined_call_operand.hbm [shape: f32[1,8], index: 1, kind: input, shape index: {}]   ;;  %s173_s2 = inlined_call_operand.hbm [shape: f32[1,1], index: 2, kind: output, shape index: {}]  }
   0x1   :  { %8 = vsyncpa [#allocation6], 0 }
   0x2   :  { %9 = vsyncpa [#allocation4], 0  ;;  %s15_s11 = sshll.u32 %s171_s0, 4  ;;  %s144_s12 = smov [#allocation2]   ;;  %s16_s11 = int_to_ptr.hbm [resolvable:$true] %s15_s11 }
   0x3   :  { %s17_s13 = sshll.u32 %s144_s12, 4  ;;  %s26_s16 = sshll.u32 %s172_s1, 4  ;;  %s18_s13 = int_to_ptr.vmem [resolvable:$true] %s17_s13  ;;  %s27_s16 = int_to_ptr.hbm [resolvable:$true] %s26_s16 }
   0x4   :  { %20 = dma.hbm_to_vmem [thread:$0]  %s16_s11, 16, %s18_s13, [#allocation3]  }
   0x5   :  { %s145_s17 = smov [#allocation5]  }
   0x6   :  { %s28_s18 = sshll.u32 %s145_s17, 4  ;;  %s29_s18 = int_to_ptr.vmem [resolvable:$true] %s28_s18 }
   0x7   :  { %31 = dma.hbm_to_vmem [thread:$0]  %s27_s16, 16, %s29_s18, [#allocation6]  }
   0x8   :  { %138 = dma.done.wait [#allocation3], 16  }
   0x9   :  { %139 = vsyncadd [#allocation3], 4294967280 }
   0xa   :  { %140 = dma.done.wait [#allocation6], 16  }
   0xb   :  { %141 = vsyncadd [#allocation6], 4294967280  ;;  %v40_v0 = vld [vmem:[#allocation2] sm:$0x1]  ;;  %v41_v1 = vld [vmem:[#allocation5] sm:$0x1] }
   0xc   :  { %vm43_vm0 = vcmask 57344   ;;  %v42_v2 = vmul.f32 %v41_v1, %v40_v0  ;;  %s61_s19 = sshll.u32 %s173_s2, 4  ;;  %s146_s21 = smov [#allocation7]   ;;  %s62_s19 = int_to_ptr.hbm [resolvable:$true] %s61_s19 }
   0xe   :  { %v44_v3 = vsel %vm43_vm0, %v42_v2, 0.0 }
   0xf   :  { %45 = vadd.xlane.f32.xlu0 %v44_v3 }
  0x82   :  { %v46_v4 = vpop.xlane.xlu0 %45 }
  0x83   :  { %v47_v5 = vrot.slane %v46_v4, 4 }
  0x85   :  { %v48_v6 = vadd.f32 %v47_v5, %v46_v4 }
  0x87   :  { %v49_v7 = vrot.slane %v48_v6, 2 }
  0x89   :  { %v50_v8 = vadd.f32 %v49_v7, %v48_v6 }
  0x8b   :  { %v51_v9 = vrot.slane %v50_v8, 1 }
  0x8d   :  { %v52_v10 = vadd.f32 %v51_v9, %v50_v8 }
  0x8f   :  { %73 = vpush %v52_v10 }
  0xc0   :  { %s74_s20 = spop %73 }
  0xc1   :  { %55 = sst [smem:[#allocation7]] %s74_s20 }
  0xc2   :  { %64 = dma.smem_to_hbm %s146_s21, 16, %s62_s19, [#allocation4]  }
  0xc3   :  { %142 = dma.done.wait [#allocation4], 16  }
  0xc4   :  { %143 = vsyncadd [#allocation4], 4294967280 }
  0xc5   :  { %69 = sfence }
  0xc6   :  { %70 = vsyncpa [#allocation3], 1 }
  0xc7   :  { %71 = vsyncpa [#allocation6], 1 }
  0xc8   :  { %72 = vsyncpa [#allocation4], 1 }

</bundles_post_ra>
